<compile_context>
chip_gen: v5e
topology: v5e:2x2
jax: 0.10.0
libtpu: 0.0.40
codegen_flags: <defaults>
</compile_context>

<pallas_src>
import functools

import jax
import jax.numpy as jnp
from jax.experimental import pallas as pl
from jax.experimental.pallas import tpu as pltpu

LANE = 128       # lane width (last-dim tiling unit)
SUBLANE_BF16 = 16  # bf16 packs 2 rows per sublane -> min clean row tile is 16


def _round_up(n, m):
    return ((n + m - 1) // m) * m


def _mlp_kernel(n_layers, in_dim, x_ref, w_ref, b_ref, out_ref):
    """Fused MLP forward for one batch tile.

      x_ref:   f32  [tile_b, in_dim]        raw (un-padded) input rows
      w_ref:   bf16 [n_layers, P, P]        zero-padded, lane-dense weight stack
      b_ref:   f32  [n_layers, P]           zero-padded bias stack
      out_ref: bf16 [tile_b, P]             lane-dense output (real cols sliced
                                            out by the wrapper)
    """
    h = x_ref[...].astype(jnp.bfloat16)            # in-kernel cast, no wrapper op
    for i in range(n_layers):
        w = w_ref[i]                               # bf16 [P, P]
        if i == 0:
            # Handle the K-padding of the first layer with a static slice of
            # the weight rows instead of zero-extending the activations.
            w = w[:in_dim, :]
        acc = jnp.dot(h, w, preferred_element_type=jnp.float32)   # MXU, f32 acc
        acc = acc + b_ref[i:i + 1, :]                              # f32 bias
        if i < n_layers - 1:                                       # ReLU (VPU)
            h = jnp.maximum(acc, 0.0).astype(jnp.bfloat16)
        else:
            h = acc
    out_ref[...] = h.astype(out_ref.dtype)          # lane-dense bf16 store


def init_params(key, input_size, output_size, inter_lin_out):
    """PyTorch-style init; weights stored [in, out] (transposed vs nn.Linear)."""
    dims = [input_size] + list(inter_lin_out) + [output_size]
    weights, biases = [], []
    for i in range(len(dims) - 1):
        key, kw, kb = jax.random.split(key, 3)
        fan_in, fan_out = dims[i], dims[i + 1]
        bound = 1.0 / jnp.sqrt(jnp.float32(fan_in))
        w = jax.random.uniform(kw, (fan_in, fan_out), jnp.float32,
                               minval=-bound, maxval=bound)
        b = jax.random.uniform(kb, (fan_out,), jnp.float32,
                               minval=-bound, maxval=bound)
        weights.append(w)
        biases.append(b)
    return weights, biases


def pack_params(weights, biases):
    """One-time packing: zero-pad every layer to a common lane-dense [P, P]
    (P = max padded feature dim, a multiple of 128), cast weights to bf16 and
    stack weights / biases into single operands (one DMA stream each)."""
    n_layers = len(weights)
    P = LANE
    for w in weights:
        P = max(P, _round_up(w.shape[0], LANE), _round_up(w.shape[1], LANE))
    w_stack = jnp.zeros((n_layers, P, P), jnp.float32)
    b_stack = jnp.zeros((n_layers, P), jnp.float32)
    for i, (w, b) in enumerate(zip(weights, biases)):
        w_stack = w_stack.at[i, :w.shape[0], :w.shape[1]].set(w)
        b_stack = b_stack.at[i, :b.shape[0]].set(b.reshape(-1))
    return w_stack.astype(jnp.bfloat16), b_stack


def _pick_tile(batch):
    """Batch tile: big (<=1024, multiple of 256) tiles for big batches, but
    always >= 2 grid steps once batch >= 32 so a 2-TC chip (v7x) can shard the
    'parallel' batch axis; tiny batches round up to one 16-row tile."""
    if batch > 256:
        half = _round_up(-(-batch // 2), 256)
        return min(1024, half)
    if batch >= 32:
        return _round_up(-(-batch // 2), SUBLANE_BF16)
    return max(SUBLANE_BF16, _round_up(batch, SUBLANE_BF16))


def waterworld_dqn_forward(x, w_stack, b_stack, out_dim):
    """x: f32 [B, input_size]; returns f32 [B, out_dim]."""
    n_layers, P, _ = w_stack.shape
    batch, in_dim = x.shape

    tile_b = _pick_tile(batch)
    b_padded = _round_up(batch, tile_b)
    if b_padded != batch:
        # Batch-only zero pad (no feature pad, no dtype cast); a no-op when the
        # batch is already a multiple of the tile (typical training batches).
        x = jnp.pad(x, ((0, b_padded - batch), (0, 0)))

    kernel = functools.partial(_mlp_kernel, n_layers, in_dim)

    # Weights / biases use constant index_maps -> fetched once, VMEM-resident
    # across all batch tiles; only the activation tile streams per grid step.
    out = pl.pallas_call(
        kernel,
        out_shape=jax.ShapeDtypeStruct((b_padded, P), jnp.bfloat16),
        grid=(b_padded // tile_b,),
        in_specs=[
            pl.BlockSpec((tile_b, in_dim), lambda i: (i, 0)),
            pl.BlockSpec(w_stack.shape, lambda i: (0, 0, 0)),
            pl.BlockSpec(b_stack.shape, lambda i: (0, 0)),
        ],
        out_specs=pl.BlockSpec((tile_b, P), lambda i: (i, 0)),
        compiler_params=pltpu.CompilerParams(
            dimension_semantics=("parallel",)),
    )(x, w_stack, b_stack)

    return out[:batch, :out_dim].astype(jnp.float32)


def reference_forward(x, weights, biases, compute_dtype=jnp.float32):
    h = x
    for i, (w, b) in enumerate(zip(weights, biases)):
        h = jnp.dot(h.astype(compute_dtype), w.astype(compute_dtype),
                    preferred_element_type=jnp.float32) + b
        if i < len(weights) - 1:
            h = jnp.maximum(h, 0.0)
    return h


if __name__ == "__main__":
    # Small WaterWorld-like config: input_size=64, hidden=[128, 128], 8 actions.
    batch = 8
    input_size = 64
    output_size = 8
    inter_lin_out = [128, 128]

    key = jax.random.PRNGKey(0)
    key, kx = jax.random.split(key)
    x = jax.random.normal(kx, (batch, input_size), jnp.float32)

    weights, biases = init_params(key, input_size, output_size, inter_lin_out)
    w_stack, b_stack = pack_params(weights, biases)

    out = waterworld_dqn_forward(x, w_stack, b_stack, output_size)
    out = jax.block_until_ready(out)
    assert out.shape == (batch, output_size)

    # Check against a reference with matching numerics (bf16 operands, f32
    # accumulation; kernel additionally rounds the final store to bf16), and a
    # looser check against pure-f32 PyTorch semantics (documents the
    # intentional bf16 weight/activation/output precision).
    ref_bf16 = reference_forward(x, weights, biases, compute_dtype=jnp.bfloat16)
    ref_f32 = reference_forward(x, weights, biases, compute_dtype=jnp.float32)
    assert jnp.allclose(out, ref_bf16, atol=1e-2, rtol=1e-2)
    assert jnp.allclose(out, ref_f32, atol=5e-2, rtol=5e-2)

    print("KERNEL_OK")
</pallas_src>

<mosaic_0001>
module attributes {stable_mosaic.version = 11 : i64} {
  func.func @_mlp_kernel(%arg0: i32, %arg1: memref<16x64xf32, #tpu.memory_space<vmem>>, %arg2: memref<3x128x128xbf16, #tpu.memory_space<vmem>>, %arg3: memref<3x128xf32, #tpu.memory_space<vmem>>, %arg4: memref<16x128xbf16, #tpu.memory_space<vmem>>) attributes {dimension_semantics = [#tpu.dimension_semantics<parallel>], iteration_bounds = array<i64: 1>, scalar_prefetch = 0 : i64, scratch_operands = 0 : i64, tpu.core_type = #tpu.core_type<tc>, window_params = [{transform_indices = @transform_0, window_bounds = array<i64: 16, 64>}, {pipeline_mode = #tpu.pipeline_mode<synchronous>, transform_indices = @transform_1, window_bounds = array<i64: 3, 128, 128>}, {pipeline_mode = #tpu.pipeline_mode<synchronous>, transform_indices = @transform_2, window_bounds = array<i64: 3, 128>}, {transform_indices = @transform_3, window_bounds = array<i64: 16, 128>}]} {
    %c0 = arith.constant 0 : index
    %c0_0 = arith.constant 0 : index
    %0 = vector.load %arg1[%c0, %c0_0] : memref<16x64xf32, #tpu.memory_space<vmem>>, vector<16x64xf32>
    %1 = arith.truncf %0 : vector<16x64xf32> to vector<16x64xbf16>
    %c0_1 = arith.constant 0 : index
    %c0_2 = arith.constant 0 : index
    %c0_3 = arith.constant 0 : index
    %2 = vector.load %arg2[%c0_1, %c0_2, %c0_3] : memref<3x128x128xbf16, #tpu.memory_space<vmem>>, vector<1x128x128xbf16>
    %3 = vector.shape_cast %2 : vector<1x128x128xbf16> to vector<128x128xbf16>
    %4 = vector.extract_strided_slice %3 {offsets = [0, 0], sizes = [64, 128], strides = [1, 1]} : vector<128x128xbf16> to vector<64x128xbf16>
    %cst = arith.constant dense<0.000000e+00> : vector<16x128xf32>
    %5 = tpu.matmul %1, %4, %cst {dimension_numbers = #tpu.dot_dimension_numbers<[1], [0], [0], [1], [0, 0, 1, 1], [], []>} : vector<16x64xbf16>, vector<64x128xbf16>, vector<16x128xf32> -> vector<16x128xf32>
    %c0_4 = arith.constant 0 : index
    %c0_5 = arith.constant 0 : index
    %6 = vector.load %arg3[%c0_4, %c0_5] : memref<3x128xf32, #tpu.memory_space<vmem>>, vector<1x128xf32>
    %7 = vector.broadcast %6 : vector<1x128xf32> to vector<16x128xf32>
    %8 = arith.addf %5, %7 : vector<16x128xf32>
    %cst_6 = arith.constant 0.000000e+00 : f32
    %9 = vector.broadcast %cst_6 : f32 to vector<16x128xf32>
    %10 = arith.maximumf %8, %9 : vector<16x128xf32>
    %11 = arith.truncf %10 : vector<16x128xf32> to vector<16x128xbf16>
    %c1 = arith.constant 1 : index
    %c0_7 = arith.constant 0 : index
    %c0_8 = arith.constant 0 : index
    %12 = vector.load %arg2[%c1, %c0_7, %c0_8] : memref<3x128x128xbf16, #tpu.memory_space<vmem>>, vector<1x128x128xbf16>
    %13 = vector.shape_cast %12 : vector<1x128x128xbf16> to vector<128x128xbf16>
    %cst_9 = arith.constant dense<0.000000e+00> : vector<16x128xf32>
    %14 = tpu.matmul %11, %13, %cst_9 {dimension_numbers = #tpu.dot_dimension_numbers<[1], [0], [0], [1], [0, 0, 1, 1], [], []>} : vector<16x128xbf16>, vector<128x128xbf16>, vector<16x128xf32> -> vector<16x128xf32>
    %c1_10 = arith.constant 1 : index
    %c0_11 = arith.constant 0 : index
    %15 = vector.load %arg3[%c1_10, %c0_11] : memref<3x128xf32, #tpu.memory_space<vmem>>, vector<1x128xf32>
    %16 = vector.broadcast %15 : vector<1x128xf32> to vector<16x128xf32>
    %17 = arith.addf %14, %16 : vector<16x128xf32>
    %cst_12 = arith.constant 0.000000e+00 : f32
    %18 = vector.broadcast %cst_12 : f32 to vector<16x128xf32>
    %19 = arith.maximumf %17, %18 : vector<16x128xf32>
    %20 = arith.truncf %19 : vector<16x128xf32> to vector<16x128xbf16>
    %c2 = arith.constant 2 : index
    %c0_13 = arith.constant 0 : index
    %c0_14 = arith.constant 0 : index
    %21 = vector.load %arg2[%c2, %c0_13, %c0_14] : memref<3x128x128xbf16, #tpu.memory_space<vmem>>, vector<1x128x128xbf16>
    %22 = vector.shape_cast %21 : vector<1x128x128xbf16> to vector<128x128xbf16>
    %cst_15 = arith.constant dense<0.000000e+00> : vector<16x128xf32>
    %23 = tpu.matmul %20, %22, %cst_15 {dimension_numbers = #tpu.dot_dimension_numbers<[1], [0], [0], [1], [0, 0, 1, 1], [], []>} : vector<16x128xbf16>, vector<128x128xbf16>, vector<16x128xf32> -> vector<16x128xf32>
    %c2_16 = arith.constant 2 : index
    %c0_17 = arith.constant 0 : index
    %24 = vector.load %arg3[%c2_16, %c0_17] : memref<3x128xf32, #tpu.memory_space<vmem>>, vector<1x128xf32>
    %25 = vector.broadcast %24 : vector<1x128xf32> to vector<16x128xf32>
    %26 = arith.addf %23, %25 : vector<16x128xf32>
    %27 = arith.truncf %26 : vector<16x128xf32> to vector<16x128xbf16>
    %c0_18 = arith.constant 0 : index
    %c0_19 = arith.constant 0 : index
    %28 = vector.load %arg4[%c0_18, %c0_19] : memref<16x128xbf16, #tpu.memory_space<vmem>>, vector<16x128xbf16>
    tpu.vector_store %arg4[%c0_18, %c0_19], %27 {strides = array<i32>} : memref<16x128xbf16, #tpu.memory_space<vmem>>, vector<16x128xbf16>,
    return
  }
  func.func @transform_0(%arg0: i32) -> (i32, i32) {
    %c0_i32 = arith.constant 0 : i32
    %c0_i32_0 = arith.constant 0 : i32
    return %arg0, %c0_i32 : i32, i32
  }
  func.func @transform_1(%arg0: i32) -> (i32, i32, i32) {
    %c0_i32 = arith.constant 0 : i32
    %c0_i32_0 = arith.constant 0 : i32
    %c0_i32_1 = arith.constant 0 : i32
    %c0_i32_2 = arith.constant 0 : i32
    return %c0_i32, %c0_i32_0, %c0_i32_1 : i32, i32, i32
  }
  func.func @transform_2(%arg0: i32) -> (i32, i32) {
    %c0_i32 = arith.constant 0 : i32
    %c0_i32_0 = arith.constant 0 : i32
    %c0_i32_1 = arith.constant 0 : i32
    return %c0_i32, %c0_i32_0 : i32, i32
  }
  func.func @transform_3(%arg0: i32) -> (i32, i32) {
    %c0_i32 = arith.constant 0 : i32
    %c0_i32_0 = arith.constant 0 : i32
    return %arg0, %c0_i32 : i32, i32
  }
}

</mosaic_0001>

<bundles_post_ra>
// kernel: tpu_custom_call.1
= control target key start
LH: loop header
LB: loop body
LE: loop exit
PB: predicated region body
PF: predicated region fallthrough
CT: control target
= control target key end

     0   :  { %8 = vsyncpa [#allocation3], 0  ;;  %s573_s0 = inlined_call_operand.hbm [shape: f32[16,64], index: 0, kind: input, shape index: {}]   ;;  %s574_s1 = inlined_call_operand.hbm [shape: bf16[3,128,128], index: 1, kind: input, shape index: {}]   ;;  %s575_s2 = inlined_call_operand.hbm [shape: f32[3,128], index: 2, kind: input, shape index: {}]   ;;  %s576_s3 = inlined_call_operand.hbm [shape: bf16[16,128], index: 3, kind: output, shape index: {}]  }
   0x1   :  { %9 = vsyncpa [#allocation6], 0  ;;  %s28_s14 = sshll.u32 %s574_s1, 4  ;;  %s29_s14 = int_to_ptr.hbm [resolvable:$true] %s28_s14 }
   0x2   :  { %10 = vsyncpa [#allocation4], 0  ;;  %s527_s15 = smov [#allocation5]   ;;  %s15_s19 = sshll.u32 %s573_s0, 4  ;;  %s16_s19 = int_to_ptr.hbm [resolvable:$true] %s15_s19 }
   0x3   :  { %s30_s16 = sshll.u32 %s527_s15, 4  ;;  %s528_s20 = smov 64   ;;  %s31_s16 = int_to_ptr.vmem [resolvable:$true] %s30_s16 }
   0x4   :  { %s529_s21 = smov 4   ;;  %s530_s22 = smov [#allocation2]  }
   0x5   :  { %36 = dma.hbm_to_vmem [thread:$0]  %s29_s14, 3072, %s31_s16, [#allocation6], %s528_s20, %s528_s20, %s529_s21  }
   0x6   :  { %s17_s23 = sshll.u32 %s530_s22, 4  ;;  %s531_s1 = smov 128   ;;  %s18_s23 = int_to_ptr.vmem [resolvable:$true] %s17_s23 }
   0x7   :  { %s532_s24 = smov 8   ;;  %s42_s27 = sshll.u32 %s575_s2, 4  ;;  %s43_s27 = int_to_ptr.hbm [resolvable:$true] %s42_s27 }
   0x8   :  { %23 = dma.hbm_to_vmem [thread:$0]  %s16_s19, 256, %s18_s23, [#allocation3], %s531_s1, %s531_s1, %s532_s24  }
   0x9   :  { %s533_s28 = smov [#allocation7]  }
   0xa   :  { %s44_s0 = sshll.u32 %s533_s28, 4  ;;  %s45_s0 = int_to_ptr.vmem [resolvable:$true] %s44_s0 }
   0xb   :  { %47 = dma.hbm_to_vmem [thread:$0]  %s43_s27, 64, %s45_s0, [#allocation6]  }
   0xc   :  { %521 = dma.done.wait [#allocation3], 256  }
   0xd   :  { %522 = vsyncadd [#allocation3], 4294967040 }
   0xe   :  { %523 = dma.done.wait [#allocation6], 3136  }
   0xf   :  { %524 = vsyncadd [#allocation6], 4294964160  ;;  %v392_v0 = vld [vmem:[#allocation5 + $0x18] sm:$0xff]  ;;  %v391_v1 = vld [vmem:[#allocation5 + $0x10] sm:$0xff]  ;;  %vm98_vm0 = vcmask 523264   ;;  %s534_s2 = smov [#allocation8]  }
  0x10   :  { %106 = vmatpush.bf16.msra.mxu0 %v392_v0  ;;  %v400_v2 = vld [vmem:[#allocation5 + $0x78] sm:$0xff]  ;;  %v399_v3 = vld [vmem:[#allocation5 + $0x70] sm:$0xff]  ;;  %v390_v4 = vld [vmem:[#allocation5 + $0x8] sm:$0xff]  ;;  %s292_s29 = sshll.u32 %s534_s2, 4  ;;  %s294_s5 = sshll.u32 %s576_s3, 4  ;;  %s293_s29 = int_to_ptr.vmem [resolvable:$true] %s292_s29  ;;  %s295_s5 = int_to_ptr.hbm [resolvable:$true] %s294_s5 }
  0x11   :  { %186 = vmatpush.bf16.msra.mxu1 %v400_v2  ;;  %v398_v5 = vld [vmem:[#allocation5 + $0x68] sm:$0xff]  ;;  %v389_v6 = vld [vmem:[#allocation5] sm:$0xff]  ;;  %v61_v7 = vld [vmem:[#allocation2] sm:$0xff] }
  0x12   :  { %v62_v8 = vld [vmem:[#allocation2 + $0x8] sm:$0xff]  ;;  %v397_v9 = vld [vmem:[#allocation5 + $0x60] sm:$0xff]  ;;  %v395_v12 = vld [vmem:[#allocation5 + $0x50] sm:$0xff] }
  0x13   :  { %v63_v10 = vpack.c.bf16 %v62_v8, %v61_v7  ;;  %v396_v11 = vld [vmem:[#allocation5 + $0x58] sm:$0xff]  ;;  %v394_v13 = vld [vmem:[#allocation5 + $0x48] sm:$0xff]  ;;  %v393_v14 = vld [vmem:[#allocation5 + $0x40] sm:$0xff] }
  0x14   :  { %107 = vmatpush.bf16.msra.mxu0 %v391_v1  ;;  %v408_v15 = vld [vmem:[#allocation5 + $0xb8] sm:$0xff]  ;;  %v407_v16 = vld [vmem:[#allocation5 + $0xb0] sm:$0xff]  ;;  %v406_v17 = vld [vmem:[#allocation5 + $0xa8] sm:$0xff] }
  0x15   :  { %187 = vmatpush.bf16.msra.mxu1 %v399_v3  ;;  %270 = vmatpush.bf16.msra.mxu2 %v408_v15  ;;  %v405_v18 = vld [vmem:[#allocation5 + $0xa0] sm:$0xff]  ;;  %v404_v27 = vld [vmem:[#allocation5 + $0x98] sm:$0xff]  ;;  %v403_v28 = vld [vmem:[#allocation5 + $0x90] sm:$0xff] }
  0x16   :  { %v422_v20 = vld [vmem:[#allocation7] ss:$0 sm:$0xff]  ;;  %v402_v29 = vld [vmem:[#allocation5 + $0x88] sm:$0xff]  ;;  %v423_v32 = vld [vmem:[#allocation7 + $0x1] ss:$0 sm:$0xff] }
  0x17   :  { %v401_v30 = vld [vmem:[#allocation5 + $0x80] sm:$0xff] }
  0x18   :  { %108 = vmatpush.bf16.msra.mxu0 %v390_v4  ;;  %v424_v40 = vld [vmem:[#allocation7 + $0x2] ss:$0 sm:$0xff] }
  0x19   :  { %188 = vmatpush.bf16.msra.mxu1 %v398_v5  ;;  %271 = vmatpush.bf16.msra.mxu2 %v407_v16 }
  0x1c   :  { %109 = vmatpush.bf16.msra.mxu0 %v389_v6 }
  0x1d   :  { %189 = vmatpush.bf16.msra.mxu1 %v397_v9  ;;  %272 = vmatpush.bf16.msra.mxu2 %v406_v17 }
  0x1f   :  { %324 = vmatmul.msk.bf16.vlgmr.msra.gmra.mxu0 %vm98_vm0, %v63_v10 }
  0x21   :  { %190 = vmatpush.bf16.msra.mxu1 %v396_v11  ;;  %273 = vmatpush.bf16.msra.mxu2 %v405_v18 }
  0x25   :  { %191 = vmatpush.bf16.msra.mxu1 %v395_v12  ;;  %274 = vmatpush.bf16.msra.mxu2 %v404_v27 }
  0x29   :  { %192 = vmatpush.bf16.msra.mxu1 %v394_v13  ;;  %275 = vmatpush.bf16.msra.mxu2 %v403_v28 }
  0x2d   :  { %193 = vmatpush.bf16.msra.mxu1 %v393_v14  ;;  %276 = vmatpush.bf16.msra.mxu2 %v402_v29 }
  0x31   :  { %277 = vmatpush.bf16.msra.mxu2 %v401_v30 }
  0x9c   :  { %v111_v19 = vpop.f32.mrf.mxu0 }
  0x9d   :  { %v112_v21 = vadd.f32 %v422_v20, %v111_v19 }
  0x9f   :  { %v116_v24 = vmax.f32 %v112_v21, 0.0 }
  0xa4   :  { %v113_v22 = vpop.f32.mrf.mxu0 }
  0xa5   :  { %v114_v23 = vadd.f32 %v422_v20, %v113_v22 }
  0xa7   :  { %v117_v25 = vmax.f32 %v114_v23, 0.0 }
  0xa9   :  { %v118_v26 = vpack.c.bf16 %v117_v25, %v116_v24 }
  0xab   :  { %194 = vmatmul.bf16.vlgmr.msra.gmra.mxu1 %v118_v26 }
 0x128   :  { %v195_v31 = vpop.f32.mrf.mxu1 }
 0x129   :  { %v196_v33 = vadd.f32 %v423_v32, %v195_v31 }
 0x12b   :  { %v200_v36 = vmax.f32 %v196_v33, 0.0 }
 0x130   :  { %v197_v34 = vpop.f32.mrf.mxu1 }
 0x131   :  { %v198_v35 = vadd.f32 %v423_v32, %v197_v34 }
 0x133   :  { %v201_v37 = vmax.f32 %v198_v35, 0.0 }
 0x135   :  { %v202_v38 = vpack.c.bf16 %v201_v37, %v200_v36 }
 0x137   :  { %278 = vmatmul.bf16.vlgmr.msra.gmra.mxu2 %v202_v38 }
 0x1ba   :  { %v279_v39 = vpop.f32.mrf.mxu2 }
 0x1bb   :  { %v280_v42 = vadd.f32 %v424_v40, %v279_v39 }
 0x1c2   :  { %v281_v41 = vpop.f32.mrf.mxu2 }
 0x1c3   :  { %v282_v43 = vadd.f32 %v424_v40, %v281_v41 }
 0x1c5   :  { %v412_v44 = vpack.c.bf16 %v282_v43, %v280_v42 }
 0x1c7   :  { %413 = vst [vmem:[#allocation8] sm:$0xff] %v412_v44  }
 0x1c8   :  { %300 = dma.vmem_to_hbm [thread:$0]  %s293_s29, 128, %s295_s5, [#allocation4], %s528_s20, %s528_s20, %s529_s21  }
 0x1c9   :  { %525 = dma.done.wait [#allocation4], 128  }
 0x1ca   :  { %526 = vsyncadd [#allocation4], 4294967168 }
 0x1cb   :  { %305 = vsyncpa [#allocation3], 1 }
 0x1cc   :  { %306 = vsyncpa [#allocation6], 1 }
 0x1cd   :  { %307 = vsyncpa [#allocation4], 1 }

</bundles_post_ra>
